<compile_context>
chip_gen: v5e
topology: v5e:2x2
jax: 0.10.0
libtpu: 0.0.40
codegen_flags: <defaults>
</compile_context>

<pallas_src>
import functools

import jax
import jax.numpy as jnp
from jax import lax
from jax.experimental import pallas as pl
from jax.experimental.pallas import tpu as pltpu


# ---------------------------------------------------------------------------
# Kernel 1: spatial-sum reduction (HBM-bandwidth bound).
# ---------------------------------------------------------------------------
def _pool_sum_kernel(x_ref, acc_ref, *, hw, hw_tile, acc_w, n_chunks,
                     n_hw_split, need_mask):
    """x_ref:  (r_tile, hw_tile) tile of x viewed as (b*c, H*W), native dtype.
    acc_ref: (r_tile, acc_w) f32 lane-resident partial-sum accumulator
             (output block, resident across the innermost grid axis)."""
    s = pl.program_id(0)        # reduction-split index (v7x dual-TC cover)
    kt = pl.program_id(2)       # spatial tile index within the split

    @pl.when(kt == 0)
    def _init():
        acc_ref[...] = jnp.zeros_like(acc_ref)

    # Global lane offset of this tile inside the true H*W extent.
    base = (s * n_hw_split + kt) * hw_tile

    if need_mask:
        lane = lax.broadcasted_iota(jnp.int32, (acc_ref.shape[0], acc_w), 1)

    acc = acc_ref[...]
    # Statically unrolled chunk loop: aligned vector loads + VPU adds only.
    for j in range(n_chunks):
        off = j * acc_w
        chunk = x_ref[:, off:off + acc_w].astype(jnp.float32)
        if need_mask:
            chunk = jnp.where(base + off + lane < hw, chunk, jnp.float32(0.0))
        acc = acc + chunk
    acc_ref[...] = acc


# ---------------------------------------------------------------------------
# Kernel 2: per-batch head (finish pooling + 1x1 conv + softplus + K build).
# Runs once on tiny data; everything stays 2-D / lane-friendly.
# ---------------------------------------------------------------------------
def _head_kernel(psum_ref, wt_ref, bias_ref, k_ref, *, inv_hw, height, width):
    """psum_ref: (b, c*acc_w) f32 spatial partial sums (row bi holds batch bi's
                 c channels, each spread over acc_w lanes).
    wt_ref:   (2, c*acc_w) f32 conv weight, pre-broadcast over the acc_w lanes.
    bias_ref: SMEM (2,) f32 conv bias.
    k_ref:    (b, 16) f32 flattened K output."""
    p = psum_ref[...]
    wt = wt_ref[...]
    inv = jnp.float32(inv_hw)

    # 1x1 conv on the pooled features: (sum_{ch,l} psum * w[ch]) / (H*W) + b.
    fx_lin = jnp.sum(p * wt[0:1, :], axis=-1, keepdims=True) * inv + bias_ref[0]
    fy_lin = jnp.sum(p * wt[1:2, :], axis=-1, keepdims=True) * inv + bias_ref[1]

    def softplus(v):  # PyTorch default: beta=1, threshold=20
        return jnp.where(v > 20.0, v, jnp.log1p(jnp.exp(jnp.minimum(v, 20.0))))

    fx = softplus(fx_lin)                                   # (b, 1)
    fy = softplus(fy_lin)                                   # (b, 1)

    wf = jnp.float32(width)
    hf = jnp.float32(height)
    # Row-major flat 4x4 K:
    #   [0]=fx*w  [2]=0.49*w  [5]=fy*h  [6]=0.49*h  [10]=1  [15]=1, rest 0.
    idx = lax.broadcasted_iota(jnp.int32, k_ref.shape, 1)
    kflat = jnp.where(
        idx == 0, fx * wf,
        jnp.where(idx == 5, fy * hf,
        jnp.where(idx == 2, jnp.float32(0.49) * wf,
        jnp.where(idx == 6, jnp.float32(0.49) * hf,
        jnp.where((idx == 10) | (idx == 15),
                  jnp.float32(1.0), jnp.float32(0.0))))))
    k_ref[...] = kflat.astype(k_ref.dtype)


def _pick_hw_tile(hw, r_tile, itemsize, target_bytes=1 << 20):
    """Largest spatial tile (multiple of 128 lanes) whose (r_tile, hw_tile)
    input buffer stays around `target_bytes`, capped at the lane-rounded H*W
    so small problems collapse to a single spatial step."""
    if hw < 128:
        return hw                                   # full-dim block (legal)
    max_lanes = max(128, (target_bytes // (r_tile * itemsize)) // 128 * 128)
    cover = pl.cdiv(hw, 128) * 128                  # hw rounded up to lanes
    return int(min(max_lanes, cover))


def intrinsics_decoder_v2(x_nchw, conv_w, conv_b, height, width):
    """x_nchw: [b, c, H, W] (native dtype); conv_w: [2, c, 1, 1]; conv_b: [2].

    Returns K: [b, 4, 4] float32.
    Assumes b > 1 (matches torch.squeeze keeping the batch dim in the module).
    """
    b, c, H, W = x_nchw.shape
    hw = H * W
    rows = b * c
    x2 = x_nchw.reshape(rows, hw)                   # free view, native dtype
    itemsize = jnp.dtype(x2.dtype).itemsize

    # --- row (sublane) tiling: fold batch*channel -> full vreg occupancy ----
    sub = {2: 16, 1: 32}.get(itemsize, 8)
    if rows >= sub:
        r_tile = sub
    elif rows >= 8:
        r_tile = 8
    else:
        r_tile = rows                               # full-dim block (legal)
    n_rows = pl.cdiv(rows, r_tile)
    rows_pad = n_rows * r_tile                      # overrun rows are garbage
                                                    # and dropped below

    # --- spatial (lane) tiling: sized by bytes (~1 MiB per input buffer) ----
    hw_tile = _pick_hw_tile(hw, r_tile, itemsize)
    acc_w = 128 if hw_tile % 128 == 0 else hw_tile  # lane-resident acc width
    n_chunks = hw_tile // acc_w
    n_hw = pl.cdiv(hw, hw_tile)
    need_mask = (n_hw * hw_tile != hw)              # ragged last tile

    # --- optional 2-way split of the reduction axis (v7x dual TensorCores) --
    n_split = 2 if (n_rows == 1 and n_hw >= 2 and n_hw % 2 == 0) else 1
    n_hw_split = n_hw // n_split

    pool_kernel = functools.partial(
        _pool_sum_kernel, hw=hw, hw_tile=hw_tile, acc_w=acc_w,
        n_chunks=n_chunks, n_hw_split=n_hw_split, need_mask=need_mask)

    psum = pl.pallas_call(
        pool_kernel,
        out_shape=jax.ShapeDtypeStruct((n_split, rows_pad, acc_w), jnp.float32),
        grid_spec=pltpu.PrefetchScalarGridSpec(
            num_scalar_prefetch=0,
            grid=(n_split, n_rows, n_hw_split),
            in_specs=[pl.BlockSpec(
                (r_tile, hw_tile),
                lambda s, r, k: (r, s * n_hw_split + k))],
            out_specs=pl.BlockSpec(
                (None, r_tile, acc_w), lambda s, r, k: (s, r, 0)),
        ),
        compiler_params=pltpu.CompilerParams(
            dimension_semantics=("parallel", "parallel", "arbitrary"),
            vmem_limit_bytes=32 * 1024 * 1024,
        ),
    )(x2)

    # Tiny XLA glue: combine reduction splits, drop padded rows, and present
    # each batch's c channel partial sums as a single lane-dense row.
    combined = jnp.sum(psum, axis=0) if n_split > 1 else psum[0]
    psum_rows = combined[:rows].reshape(b, c * acc_w)                 # f32
    wt_expand = jnp.repeat(
        conv_w.reshape(2, c).astype(jnp.float32), acc_w, axis=1)      # (2, c*acc_w)
    bias = conv_b.reshape(2).astype(jnp.float32)

    head_kernel = functools.partial(
        _head_kernel, inv_hw=1.0 / float(hw),
        height=float(height), width=float(width))

    k_flat = pl.pallas_call(
        head_kernel,
        out_shape=jax.ShapeDtypeStruct((b, 16), jnp.float32),
        grid_spec=pltpu.PrefetchScalarGridSpec(
            num_scalar_prefetch=0,
            grid=(1,),
            in_specs=[
                pl.BlockSpec((b, c * acc_w), lambda i: (0, 0)),
                pl.BlockSpec((2, c * acc_w), lambda i: (0, 0)),
                pl.BlockSpec(memory_space=pltpu.MemorySpace.SMEM),
            ],
            out_specs=pl.BlockSpec((b, 16), lambda i: (0, 0)),
        ),
    )(psum_rows, wt_expand, bias)
    return k_flat.reshape(b, 4, 4)


def _reference(x_nchw, conv_w, conv_b, height, width):
    b, c, _, _ = x_nchw.shape
    pooled = x_nchw.astype(jnp.float32).mean(axis=(2, 3))             # [b, c]
    w = conv_w.reshape(2, c).astype(jnp.float32)
    intr = pooled @ w.T + conv_b.astype(jnp.float32)
    sp = jax.nn.softplus(intr)
    diag = jnp.concatenate([sp, jnp.ones((b, 2), sp.dtype)], axis=1)
    K = jax.vmap(jnp.diag)(diag)
    K = K.at[:, 0, 2].set(0.49)
    K = K.at[:, 1, 2].set(0.49)
    K = K.at[:, 0, :].multiply(width)
    K = K.at[:, 1, :].multiply(height)
    return K


if __name__ == "__main__":
    root = jax.random.PRNGKey(0)
    img_height, img_width = 192, 640   # module config (self.height / self.width)

    cases = [
        # (b, c, H, W, dtype)  -- first is the canonical small test.
        (2, 4, 16, 16, jnp.float32),    # single spatial tile, full 8-row vreg
        (3, 6, 9, 21, jnp.float32),     # ragged H*W (masked tile) + row overrun
        (2, 8, 127, 33, jnp.bfloat16),  # bf16 input, 16-row tile, 33-chunk loop
        (2, 4, 256, 256, jnp.float32),  # 2 spatial tiles -> 2-way core split
    ]
    for idx, (b, c, H, W, dtype) in enumerate(cases):
        k1, k2, k3 = jax.random.split(jax.random.fold_in(root, idx), 3)
        x = jax.random.normal(k1, (b, c, H, W), jnp.float32).astype(dtype)
        conv_w = jax.random.normal(k2, (2, c, 1, 1), jnp.float32) * 0.1
        conv_b = jax.random.normal(k3, (2,), jnp.float32) * 0.1

        K = intrinsics_decoder_v2(x, conv_w, conv_b, img_height, img_width)
        jax.block_until_ready(K)

        K_ref = _reference(x, conv_w, conv_b, img_height, img_width)
        assert K.shape == (b, 4, 4)
        assert jnp.allclose(K, K_ref, atol=1e-3, rtol=1e-3), (idx, K, K_ref)

    print("KERNEL_OK")
</pallas_src>

<mosaic_0001>
module attributes {stable_mosaic.version = 11 : i64} {
  func.func @_pool_sum_kernel(%arg0: i32, %arg1: i32, %arg2: i32, %arg3: memref<8x256xf32, #tpu.memory_space<vmem>>, %arg4: memref<1x8x128xf32, #tpu.memory_space<vmem>>) attributes {dimension_semantics = [#tpu.dimension_semantics<parallel>, #tpu.dimension_semantics<parallel>, #tpu.dimension_semantics<arbitrary>], iteration_bounds = array<i64: 1, 1, 1>, scalar_prefetch = 0 : i64, scratch_operands = 0 : i64, tpu.core_type = #tpu.core_type<tc>, window_params = [{transform_indices = @transform_0, window_bounds = array<i64: 8, 256>}, {transform_indices = @transform_1, window_bounds = array<i64: 1, 8, 128>}]} {
    %c0_i32 = arith.constant 0 : i32
    %0 = arith.cmpi eq, %arg2, %c0_i32 : i32
    %1 = arith.extui %0 : i1 to i32
    %c0_i32_0 = arith.constant 0 : i32
    %2 = arith.cmpi ne, %1, %c0_i32_0 : i32
    scf.if %2 {
      %cst = arith.constant 0.000000e+00 : f32
      %12 = vector.broadcast %cst : f32 to vector<8x128xf32>
      %c0_9 = arith.constant 0 : index
      %c0_10 = arith.constant 0 : index
      %c0_11 = arith.constant 0 : index
      %13 = vector.load %arg4[%c0_9, %c0_10, %c0_11] : memref<1x8x128xf32, #tpu.memory_space<vmem>>, vector<1x8x128xf32>
      %14 = vector.shape_cast %13 : vector<1x8x128xf32> to vector<8x128xf32>
      %15 = vector.shape_cast %12 : vector<8x128xf32> to vector<1x8x128xf32>
      tpu.vector_store %arg4[%c0_9, %c0_10, %c0_11], %15 {strides = array<i32>} : memref<1x8x128xf32, #tpu.memory_space<vmem>>, vector<1x8x128xf32>,
    } else {
    }
    %c0 = arith.constant 0 : index
    %c0_1 = arith.constant 0 : index
    %c0_2 = arith.constant 0 : index
    %3 = vector.load %arg4[%c0, %c0_1, %c0_2] : memref<1x8x128xf32, #tpu.memory_space<vmem>>, vector<1x8x128xf32>
    %4 = vector.shape_cast %3 : vector<1x8x128xf32> to vector<8x128xf32>
    %c0_3 = arith.constant 0 : index
    %c0_4 = arith.constant 0 : index
    %5 = vector.load %arg3[%c0_3, %c0_4] : memref<8x256xf32, #tpu.memory_space<vmem>>, vector<8x128xf32>
    %6 = arith.addf %4, %5 : vector<8x128xf32>
    %c0_5 = arith.constant 0 : index
    %c128 = arith.constant 128 : index
    %7 = vector.load %arg3[%c0_5, %c128] : memref<8x256xf32, #tpu.memory_space<vmem>>, vector<8x128xf32>
    %8 = arith.addf %6, %7 : vector<8x128xf32>
    %c0_6 = arith.constant 0 : index
    %c0_7 = arith.constant 0 : index
    %c0_8 = arith.constant 0 : index
    %9 = vector.load %arg4[%c0_6, %c0_7, %c0_8] : memref<1x8x128xf32, #tpu.memory_space<vmem>>, vector<1x8x128xf32>
    %10 = vector.shape_cast %9 : vector<1x8x128xf32> to vector<8x128xf32>
    %11 = vector.shape_cast %8 : vector<8x128xf32> to vector<1x8x128xf32>
    tpu.vector_store %arg4[%c0_6, %c0_7, %c0_8], %11 {strides = array<i32>} : memref<1x8x128xf32, #tpu.memory_space<vmem>>, vector<1x8x128xf32>,
    return
  }
  func.func @transform_0(%arg0: i32, %arg1: i32, %arg2: i32) -> (i32, i32) {
    %c1_i32 = arith.constant 1 : i32
    %0 = arith.muli %arg0, %c1_i32 : i32
    %1 = arith.addi %0, %arg2 : i32
    %c0_i32 = arith.constant 0 : i32
    return %arg1, %1 : i32, i32
  }
  func.func @transform_1(%arg0: i32, %arg1: i32, %arg2: i32) -> (i32, i32, i32) {
    %c0_i32 = arith.constant 0 : i32
    %c0_i32_0 = arith.constant 0 : i32
    return %arg0, %arg1, %c0_i32 : i32, i32, i32
  }
}

</mosaic_0001>

<bundles_post_ra>
// kernel: tpu_custom_call.1
= control target key start
LH: loop header
LB: loop body
LE: loop exit
PB: predicated region body
PF: predicated region fallthrough
CT: control target
= control target key end

     0   :  { %6 = vsyncpa [#allocation3], 0  ;;  %s130_s0 = inlined_call_operand.hbm [shape: f32[8,256], index: 0, kind: input, shape index: {}]   ;;  %s131_s1 = inlined_call_operand.hbm [shape: f32[1,8,128], index: 1, kind: output, shape index: {}]  }
   0x1   :  { %7 = vsyncpa [#allocation4], 0  ;;  %s17_s8 = sshll.u32 %s130_s0, 4  ;;  %s112_s9 = smov [#allocation2]   ;;  %s18_s8 = int_to_ptr.hbm [resolvable:$true] %s17_s8 }
   0x2   :  { %s19_s10 = sshll.u32 %s112_s9, 4  ;;  %s20_s10 = int_to_ptr.vmem [resolvable:$true] %s19_s10 }
   0x3   :  { %22 = dma.hbm_to_vmem [thread:$0]  %s18_s8, 256, %s20_s10, [#allocation3]  }
   0x4   :  { %108 = dma.done.wait [#allocation3], 256  }
   0x5   :  { %109 = vsyncadd [#allocation3], 4294967040  ;;  %v35_v0 = vld [vmem:[#allocation2] sm:$0xff]  ;;  %v37_v1 = vld [vmem:[#allocation2 + $0x8] sm:$0xff]  ;;  %s113_s11 = smov [#allocation5]   ;;  %s47_s15 = sshll.u32 %s131_s1, 4  ;;  %s48_s15 = int_to_ptr.hbm [resolvable:$true] %s47_s15 }
   0x6   :  { %s45_s12 = sshll.u32 %s113_s11, 4  ;;  %v38_v2 = vadd.f32 %v37_v1, %v35_v0  ;;  %s46_s12 = int_to_ptr.vmem [resolvable:$true] %s45_s12 }
   0x8   :  { %39 = vst [vmem:[#allocation5] sm:$0xff] %v38_v2 }
   0x9   :  { %50 = dma.vmem_to_hbm [thread:$0]  %s46_s12, 128, %s48_s15, [#allocation4]  }
   0xa   :  { %110 = dma.done.wait [#allocation4], 128  }
   0xb   :  { %111 = vsyncadd [#allocation4], 4294967168 }
   0xc   :  { %55 = vsyncpa [#allocation3], 1 }
   0xd   :  { %56 = vsyncpa [#allocation4], 1 }

</bundles_post_ra>
